<compile_context>
chip_gen: v6e
topology: v6e:2x2x1
jax: 0.10.0
libtpu: 0.0.40
codegen_flags: <defaults>
</compile_context>

<pallas_src>
import jax
import jax.numpy as jnp
from jax.experimental import pallas as pl
from jax.experimental.pallas import tpu as pltpu

LANES = 128
SUBLANES = 8
NUM_CORES = 2  # leading "parallel" grid axis; correct on 1-TC chips too


def _cdiv(a, b):
    return (a + b - 1) // b


def _round_up(a, m):
    return _cdiv(a, m) * m


def _wloss_kernel(pred_ref, tgt_ref, out_ref, acc_ref):
    """grid = (NUM_CORES, steps_per_core); reduction axis is axis 1."""
    j = pl.program_id(1)

    @pl.when(j == 0)
    def _():
        acc_ref[...] = jnp.zeros_like(acc_ref)

    p = pred_ref[...].astype(jnp.float32)
    t = tgt_ref[...].astype(jnp.float32)
    prod = p * t                                   # (tile_rows, 128) f32, pure VPU
    # Fold (tile_rows, 128) -> (8, 128): vreg-wise adds only (no XLU per step).
    acc_ref[...] += jnp.sum(prod.reshape(-1, SUBLANES, LANES), axis=0)

    @pl.when(j == pl.num_programs(1) - 1)
    def _():
        out_ref[...] = acc_ref[...]                # per-core partial-sum slab


def wasserstein_loss(pred, target, *, tile_rows=1024):
    """loss = -mean(pred * target).  Returns a scalar float32."""
    assert pred.shape == target.shape, "pred/target must have identical shapes"
    n_elems = pred.size

    # Sublane packing multiple for the block's second-to-last dim
    # (f32 -> 8, bf16 -> 16, int8 -> 32).
    sub = max(SUBLANES, 32 // jnp.dtype(pred.dtype).itemsize)

    rows = _cdiv(n_elems, LANES)
    per_core_rows = _round_up(_cdiv(rows, NUM_CORES), sub)
    tr = min(_round_up(tile_rows, sub), per_core_rows)        # effective tile rows
    steps_per_core = _cdiv(per_core_rows, tr)
    rows_padded = NUM_CORES * steps_per_core * tr
    padded_len = rows_padded * LANES

    # Flatten in native dtype; pad only if the layout actually requires it
    # (zero padding contributes 0 to the sum, so it is numerically inert).
    p_flat = pred.reshape(-1)
    t_flat = target.reshape(-1)
    if padded_len != n_elems:
        p_flat = jnp.pad(p_flat, (0, padded_len - n_elems))
        t_flat = jnp.pad(t_flat, (0, padded_len - n_elems))
    p2d = p_flat.reshape(rows_padded, LANES)
    t2d = t_flat.reshape(rows_padded, LANES)

    def in_map(c, j):
        return (c * steps_per_core + j, 0)

    out = pl.pallas_call(
        _wloss_kernel,
        out_shape=jax.ShapeDtypeStruct((NUM_CORES * SUBLANES, LANES), jnp.float32),
        grid_spec=pltpu.PrefetchScalarGridSpec(
            num_scalar_prefetch=0,
            grid=(NUM_CORES, steps_per_core),
            in_specs=[
                pl.BlockSpec((tr, LANES), in_map),
                pl.BlockSpec((tr, LANES), in_map),
            ],
            # One lane-dense (8,128) partial-sum block per core.
            out_specs=pl.BlockSpec((SUBLANES, LANES), lambda c, j: (c, 0)),
            scratch_shapes=[pltpu.VMEM((SUBLANES, LANES), jnp.float32)],
        ),
        compiler_params=pltpu.CompilerParams(
            dimension_semantics=("parallel", "arbitrary"),
        ),
    )(p2d, t2d)

    # Tiny final cross-lane reduce (16x128 f32) + negate + /N outside the kernel.
    return -(jnp.sum(out) / jnp.float32(n_elems))


if __name__ == "__main__":
    key = jax.random.PRNGKey(0)
    k1, k2 = jax.random.split(key)

    # Shapes consistent with a GAN discriminator output vs. target map:
    # batch=2, channels=4, spatial=16x16.
    pred = jax.random.normal(k1, (2, 4, 16, 16), dtype=jnp.float32)
    target = jax.random.normal(k2, (2, 4, 16, 16), dtype=jnp.float32)

    loss = wasserstein_loss(pred, target)
    loss = jax.block_until_ready(loss)

    # Pure-JAX reference (same semantics as torch: -mean(pred * target)).
    ref = -jnp.mean(pred * target)
    assert jnp.allclose(loss, ref, rtol=1e-5, atol=1e-6), (loss, ref)

    print("KERNEL_OK")
</pallas_src>

<mosaic_0001>
module attributes {stable_mosaic.version = 11 : i64} {
  func.func @_wloss_kernel(%arg0: i32, %arg1: i32, %arg2: memref<8x128xf32, #tpu.memory_space<vmem>>, %arg3: memref<8x128xf32, #tpu.memory_space<vmem>>, %arg4: memref<8x128xf32, #tpu.memory_space<vmem>>, %arg5: memref<8x128xf32, #tpu.memory_space<vmem>>) attributes {dimension_semantics = [#tpu.dimension_semantics<parallel>, #tpu.dimension_semantics<arbitrary>], iteration_bounds = array<i64: 2, 1>, scalar_prefetch = 0 : i64, scratch_operands = 1 : i64, tpu.core_type = #tpu.core_type<tc>, window_params = [{transform_indices = @transform_0, window_bounds = array<i64: 8, 128>}, {transform_indices = @transform_1, window_bounds = array<i64: 8, 128>}, {transform_indices = @transform_2, window_bounds = array<i64: 8, 128>}]} {
    %c0_i32 = arith.constant 0 : i32
    %0 = arith.cmpi eq, %arg1, %c0_i32 : i32
    %1 = arith.extui %0 : i1 to i32
    %c0_i32_0 = arith.constant 0 : i32
    %2 = arith.cmpi ne, %1, %c0_i32_0 : i32
    scf.if %2 {
      %cst_10 = arith.constant 0.000000e+00 : f32
      %14 = vector.broadcast %cst_10 : f32 to vector<8x128xf32>
      %c0_11 = arith.constant 0 : index
      %c0_12 = arith.constant 0 : index
      %15 = vector.load %arg5[%c0_11, %c0_12] : memref<8x128xf32, #tpu.memory_space<vmem>>, vector<8x128xf32>
      tpu.vector_store %arg5[%c0_11, %c0_12], %14 {strides = array<i32>} : memref<8x128xf32, #tpu.memory_space<vmem>>, vector<8x128xf32>,
    } else {
    }
    %c0 = arith.constant 0 : index
    %c0_1 = arith.constant 0 : index
    %3 = vector.load %arg2[%c0, %c0_1] : memref<8x128xf32, #tpu.memory_space<vmem>>, vector<8x128xf32>
    %c0_2 = arith.constant 0 : index
    %c0_3 = arith.constant 0 : index
    %4 = vector.load %arg3[%c0_2, %c0_3] : memref<8x128xf32, #tpu.memory_space<vmem>>, vector<8x128xf32>
    %5 = arith.mulf %3, %4 : vector<8x128xf32>
    %c0_4 = arith.constant 0 : index
    %c0_5 = arith.constant 0 : index
    %6 = vector.load %arg5[%c0_4, %c0_5] : memref<8x128xf32, #tpu.memory_space<vmem>>, vector<8x128xf32>
    %7 = vector.shape_cast %5 : vector<8x128xf32> to vector<1x8x128xf32>
    %cst = arith.constant dense<0.000000e+00> : vector<8x128xf32>
    %8 = vector.multi_reduction <add>, %7, %cst [0] : vector<1x8x128xf32> to vector<8x128xf32>
    %9 = arith.addf %6, %8 : vector<8x128xf32>
    %c0_6 = arith.constant 0 : index
    %c0_7 = arith.constant 0 : index
    %10 = vector.load %arg5[%c0_6, %c0_7] : memref<8x128xf32, #tpu.memory_space<vmem>>, vector<8x128xf32>
    tpu.vector_store %arg5[%c0_6, %c0_7], %9 {strides = array<i32>} : memref<8x128xf32, #tpu.memory_space<vmem>>, vector<8x128xf32>,
    %c0_i32_8 = arith.constant 0 : i32
    %11 = arith.cmpi eq, %arg1, %c0_i32_8 : i32
    %12 = arith.extui %11 : i1 to i32
    %c0_i32_9 = arith.constant 0 : i32
    %13 = arith.cmpi ne, %12, %c0_i32_9 : i32
    scf.if %13 {
      %c0_10 = arith.constant 0 : index
      %c0_11 = arith.constant 0 : index
      %14 = vector.load %arg5[%c0_10, %c0_11] : memref<8x128xf32, #tpu.memory_space<vmem>>, vector<8x128xf32>
      %c0_12 = arith.constant 0 : index
      %c0_13 = arith.constant 0 : index
      %15 = vector.load %arg4[%c0_12, %c0_13] : memref<8x128xf32, #tpu.memory_space<vmem>>, vector<8x128xf32>
      tpu.vector_store %arg4[%c0_12, %c0_13], %14 {strides = array<i32>} : memref<8x128xf32, #tpu.memory_space<vmem>>, vector<8x128xf32>,
    } else {
    }
    return
  }
  func.func @transform_0(%arg0: i32, %arg1: i32) -> (i32, i32) {
    %c1_i32 = arith.constant 1 : i32
    %0 = arith.muli %arg0, %c1_i32 : i32
    %1 = arith.addi %0, %arg1 : i32
    %c0_i32 = arith.constant 0 : i32
    %c0_i32_0 = arith.constant 0 : i32
    return %1, %c0_i32 : i32, i32
  }
  func.func @transform_1(%arg0: i32, %arg1: i32) -> (i32, i32) {
    %c1_i32 = arith.constant 1 : i32
    %0 = arith.muli %arg0, %c1_i32 : i32
    %1 = arith.addi %0, %arg1 : i32
    %c0_i32 = arith.constant 0 : i32
    %c0_i32_0 = arith.constant 0 : i32
    return %1, %c0_i32 : i32, i32
  }
  func.func @transform_2(%arg0: i32, %arg1: i32) -> (i32, i32) {
    %c0_i32 = arith.constant 0 : i32
    %c0_i32_0 = arith.constant 0 : i32
    return %arg0, %c0_i32 : i32, i32
  }
}

</mosaic_0001>

<bundles_post_ra>
// kernel: tpu_custom_call.1
= control target key start
LH: loop header
LB: loop body
LE: loop exit
PB: predicated region body
PF: predicated region fallthrough
CT: control target
= control target key end

     0   :  { %7 = vsyncpa [#allocation4], 0  ;;  %s754_s0 = inlined_call_operand.hbm [shape: f32[16,128], index: 0, kind: input, shape index: {}]   ;;  %s755_s1 = inlined_call_operand.hbm [shape: f32[16,128], index: 1, kind: input, shape index: {}]   ;;  %s756_s2 = inlined_call_operand.hbm [shape: f32[16,128], index: 2, kind: output, shape index: {}]  }
   0x1   :  { %9 = vsyncpa [#allocation4 + $0x1], 0 }
   0x2   :  { %10 = vsyncpa [#allocation7], 0 }
   0x3   :  { %12 = vsyncpa [#allocation7 + $0x1], 0 }
   0x4   :  { %13 = vsyncpa [#allocation5], 0 }
   0x5   :  { %15 = vsyncpa [#allocation5 + $0x1], 0  ;;  %s593_s9 = smov 0   ;;  %s595_s10 = smov 0  }
   0x6   :  { %s597_s11 = smov 0   ;;  %s599_s12 = smov 0  }
   0x7   :  { %s601_s13 = smov 0   ;;  %s603_s14 = smov 0  }
   0x8 LB: > { %s350_s15 = sadd.s32 4294967295, %s573_s14   ;;  %s351_s16 = sadd.s32 4294967294, %s573_s14   ;;  %s573_s14 = sphi %s603_s14, %s21_s14   ;;  %s569_s13 = sphi %s601_s13, %s768_s13   ;;  %s565_s12 = sphi %s599_s12, %s767_s12   ;;  %s561_s11 = sphi %s597_s11, %s766_s11   ;;  %s557_s10 = sphi %s595_s10, %s765_s10   ;;  %s553_s9 = sphi %s593_s9, %s764_s9  }
   0x9   : > { %s33_s17 = sadd.s32 1, %s569_s13  ;;  %s42_s18 = sadd.s32 1, %s561_s11 }
   0xa   : > { %p35_p0 = scmp.ge.s32.totalorder %s33_s17, 2  ;;  %p49_p1 = scmp.ne.s32.totalorder %s561_s11, %s557_s10 }
   0xb   : > { %p50_p2 = scmp.eq.s32.totalorder %s573_s14, 0  ;;  %p55_p3 = scmp.ne.s32.totalorder %s557_s10, %s553_s9 }
   0xc   : > { %s770_s17 = smov (%p35_p0, %s33_s17), 0  ;;  %p56_p5 = scmp.eq.s32.totalorder %s350_s15, 0 }
   0xd   : > { %p634_p4 = por %p50_p2, %p49_p1  ;;  %s39_s20 = ssub.s32 %s569_s13, %s770_s17 }
   0xe   : > { %p107_p6 = scmp.eq.s32.totalorder %s350_s15, 1  ;;  %p40_p7 = scmp.eq.s32.totalorder %s39_s20, 0 }
   0xf   : > { %p640_p8 = por %p56_p5, %p55_p3  ;;  %p113_p10 = scmp.eq.s32.totalorder %s351_s16, 1 }
  0x10   : > { %p644_p9 = por %p107_p6, %p49_p1  ;;  %p383_p13 = scmp.lt.s32.totalorder %s573_s14, 2 }
  0x11   : > { %s649_s23 = scalar_select %p40_p7, %s561_s11, %s42_s18  }
  0x12   : > { %p651_p11 = por %p113_p10, %p55_p3  ;;  %s658_s25 = sand.u32 1, %s561_s11  }
  0x13   : > { %s354_s26 = sshll.u32 %s658_s25, 3  ;;  %s355_s27 = sshll.u32 %s569_s13, 7 }
  0x14   : > { %s143_s30 = scalar_lea.hbm %s754_s0, %s355_s27  ;;  %s137_s3 = scalar_lea.vmem [#allocation3], %s354_s26 }
  0x15   : > { %s145_s4 = sshll.u32 %s137_s3, 4  ;;  %p667_p0 = pnand %p383_p13, %p634_p4  ;;  %s146_s4 = int_to_ptr.vmem [resolvable:$true] %s145_s4 }
  0x16   : > { %p358_p1 = scmp.ge.s32.totalorder %s573_s14, 1  ;;  %p169_p2 = scmp.lt.s32.totalorder %s573_s14, 3 }
  0x17   : > { %s134_s6 = scalar_lea.sflag [#allocation4], %s658_s25  ;;  %p435_p3 = pneg %p667_p0 }
  0x18   : > { %s446_s7 = scalar_lea.vmem %s146_s4, 128  ;;  %s575_s8 = smov [#allocation3]  }
  0x19   : > { %p447_p5 = scmp.ne.s32.totalorder %s146_s4, %s446_s7  ;;  %s451_s15 = sshll.u32 %s575_s8, 4  ;;  %s452_s15 = int_to_ptr.vmem [resolvable:$false] %s451_s15 }
  0x1a   : > { %s453_s16 = scalar_lea.vmem %s452_s15, 256  ;;  %p454_p4 = scmp.lt.s32.totalorder %s146_s4, %s452_s15 }
  0x1b   : > { %p449_p6 = pnand %p447_p5, %p435_p3  ;;  %p455_p10 = scmp.lt.s32.totalorder %s453_s16, %s446_s7 }
  0x1d   : > { %p450_p7 = pneg %p449_p6  ;;  %p456_p13 = por %p455_p10, %p454_p4 }
  0x1f   : > { %p457_p12 = pnand %p456_p13, %p450_p7 }
  0x21   : > { %460 = shalt.err (!%p457_p12)
}
  0x22   : > { %375 = dma.hbm_to_vmem [thread:$0]  (!%p667_p0), %s143_s30, 128, %s146_s4, %s134_s6  }
  0x23   : > { %p685_p5 = pnand %p358_p1, %p169_p2  ;;  %s162_s28 = scalar_lea.hbm %s755_s1, %s355_s27 }
  0x24   : > { %s156_s29 = scalar_lea.vmem [#allocation6], %s354_s26  ;;  %s153_s7 = scalar_lea.sflag [#allocation7], %s658_s25 }
  0x25   : > { %s164_s3 = sshll.u32 %s156_s29, 4  ;;  %s576_s30 = smov [#allocation6]   ;;  %s165_s3 = int_to_ptr.vmem [resolvable:$true] %s164_s3 }
  0x26   : > { %s474_s8 = scalar_lea.vmem %s165_s3, 128  ;;  %s479_s4 = sshll.u32 %s576_s30, 4  ;;  %s480_s4 = int_to_ptr.vmem [resolvable:$false] %s479_s4 }
  0x27   : > { %p475_p12 = scmp.ne.s32.totalorder %s165_s3, %s474_s8  ;;  %s481_s6 = scalar_lea.vmem %s480_s4, 256 }
  0x28   : > { %p482_p1 = scmp.lt.s32.totalorder %s165_s3, %s480_s4  ;;  %p483_p2 = scmp.lt.s32.totalorder %s481_s6, %s474_s8 }
  0x29   : > { %p477_p6 = pnand %p475_p12, %p435_p3 }
  0x2a   : > { %p484_p4 = por %p483_p2, %p482_p1 }
  0x2b   : > { %p478_p7 = pneg %p477_p6 }
  0x2d   : > { %p485_p10 = pnand %p484_p4, %p478_p7 }
  0x2f   : > { %488 = shalt.err (!%p485_p10)
}
  0x30   : > { %378 = dma.hbm_to_vmem [thread:$0]  (!%p667_p0), %s162_s28, 128, %s165_s3, %s153_s7  }
  0x31   : > { %173 = sbr.rel (%p685_p5) target bundleno = 81 (0x51), region = 28  ;;  %s701_s25 = sand.u32 (!%p685_p5), 1, %s557_s10  }
  0x32   : > { %s359_s26 = sshll.u32 (!%p685_p5), %s701_s25, 3  ;;  %s176_s27 = scalar_lea.sflag (!%p685_p5), [#allocation4], %s701_s25 }
  0x33   : > { %s179_s15 = scalar_lea.vmem (!%p685_p5), [#allocation3], %s359_s26 }
  0x36   : > { %540 = dma.done.wait (%p640_p8), %s176_s27, 128  }
  0x37   : > { %542 = vsyncadd (%p640_p8), %s176_s27, 4294967168  ;;  %s185_s5 = scalar_lea.sflag [#allocation7], %s701_s25  ;;  %s188_s16 = scalar_lea.vmem [#allocation6], %s359_s26 }
  0x38   : > { %544 = dma.done.wait (%p640_p8), %s185_s5, 128  }
  0x39   : > { %546 = vsyncadd (%p640_p8), %s185_s5, 4294967168  ;;  %s213_s18 = scalar_lea.vmem [#allocation8], %s359_s26  ;;  %s363_s20 = sshll.u32 %s565_s12, 7  ;;  %v221_v0 = vld [vmem:[%s179_s15] sm:$0xff]  ;;  %v222_v1 = vld [vmem:[%s188_s16] sm:$0xff] }
  0x3a   : > { %s247_s19 = sshll.u32 %s213_s18, 4  ;;  %v223_v2 = vmul.f32 %v222_v1, %v221_v0  ;;  %s245_s3 = scalar_lea.hbm %s756_s2, %s363_s20  ;;  %s248_s19 = int_to_ptr.vmem [resolvable:$true] %s247_s19 }
  0x3b   : > { %s234_s7 = scalar_lea.sflag [#allocation5], %s701_s25  ;;  %s489_s8 = scalar_lea.vmem %s248_s19, 128 }
  0x3c   : > { %232 = vst [vmem:[%s213_s18] sm:$0xff] %v223_v2  ;;  %p490_p0 = scmp.ne.s32.totalorder %s248_s19, %s489_s8  ;;  %s577_s21 = smov [#allocation8]  }
  0x3d   : > { %s493_s30 = sshll.u32 %s577_s21, 4  ;;  %s494_s30 = int_to_ptr.vmem [resolvable:$false] %s493_s30 }
  0x3e   : > { %p491_p8 = pnand %p490_p0, %p644_p9  ;;  %s495_s4 = scalar_lea.vmem %s494_s30, 256 }
  0x3f   : > { %p496_p13 = scmp.lt.s32.totalorder %s248_s19, %s494_s30  ;;  %p497_p5 = scmp.lt.s32.totalorder %s495_s4, %s489_s8 }
  0x40   : > { %p492_p3 = pneg %p491_p8 }
  0x41   : > { %p498_p12 = por %p497_p5, %p496_p13 }
  0x43   : > { %p499_p6 = pnand %p498_p12, %p492_p3 }
  0x45   : > { %502 = shalt.err (!%p499_p6)
}
  0x46   : > { %s503_s12 = scalar_lea.hbm %s245_s3, 128  ;;  %s507_s26 = scalar_lea.hbm %s756_s2, 256 }
  0x47   : > { %p504_p7 = scmp.ne.s32.totalorder %s245_s3, %s503_s12  ;;  %p508_p4 = scmp.lt.s32.totalorder %s245_s3, %s756_s2 }
  0x48   : > { %p509_p10 = scmp.lt.s32.totalorder %s507_s26, %s503_s12 }
  0x49   : > { %p505_p1 = pnand %p504_p7, %p644_p9 }
  0x4a   : > { %p510_p0 = por %p509_p10, %p508_p4 }
  0x4b   : > { %p506_p2 = pneg %p505_p1 }
  0x4d   : > { %p511_p8 = pnand %p510_p0, %p506_p2 }
  0x4f   : > { %514 = shalt.err (!%p511_p8)
}
  0x50   : > { %370 = dma.vmem_to_hbm [thread:$0]  (%p644_p9), %s248_s19, 128, %s245_s3, %s234_s7  }
  0x51 PF: > { %s259_s5 = sand.u32 1, %s553_s9   ;;  %p763_p3 = scmp.ge.s32.totalorder %s573_s14, 2 }
  0x52   : > { %s260_s16 = scalar_lea.sflag [#allocation5], %s259_s5 }
  0x53   : > { %p380_p13 = pnand %p763_p3, %p651_p11 }
  0x55   : > { %p381_p5 = pneg %p380_p13 }
  0x57   : > { %548 = dma.done.wait (%p381_p5), %s260_s16, 128  }
  0x58   : > { %550 = vsyncadd (%p381_p5), %s260_s16, 4294967168  ;;  %s21_s14 = sadd.s32 1, %s573_s14   ;;  %s764_s9 = smov %s557_s10 }
  0x59   : > { %p18_p12 = scmp.ge.s32.totalorder %s21_s14, 4   ;;  %s765_s10 = smov %s561_s11 }
  0x5a   : > { %s766_s11 = smov %s649_s23  ;;  %s767_s12 = smov %s569_s13 }
  0x5b   : > { %s768_s13 = smov %s770_s17  ;;  %20 = sbr.rel (!%p18_p12) target bundleno = 8 (0x8), region = 94 }
  0x60   :  { %265 = vsyncpa [#allocation4], 1 }
  0x61   :  { %267 = vsyncpa [#allocation4 + $0x1], 1 }
  0x62   :  { %268 = vsyncpa [#allocation7], 1 }
  0x63   :  { %270 = vsyncpa [#allocation7 + $0x1], 1 }
  0x64   :  { %271 = vsyncpa [#allocation5], 1 }
  0x65   :  { %273 = vsyncpa [#allocation5 + $0x1], 1 }

</bundles_post_ra>
